<compile_context>
chip_gen: v7x
topology: tpu7x:2x2x1
jax: 0.10.0
libtpu: 0.0.40
codegen_flags: <defaults>
</compile_context>

<pallas_src>
import functools
import math

import jax
import jax.numpy as jnp
from jax import lax
from jax.experimental import pallas as pl
from jax.experimental.pallas import tpu as pltpu


def _round_up(x, m):
    return (x + m - 1) // m * m


def _batch_tiling(B, tile_b):
    """Choose (n_tiles, tb, B_pad): tb is a multiple of 8, padding is minimal
    (at most 8*n_tiles-1 rows), and the grid is even (>=2 tiles) when the batch
    is large enough so the 'parallel' batch axis can shard across v7x's 2 TCs."""
    tile_b = max(8, _round_up(int(tile_b), 8))
    n_tiles = -(-B // tile_b)
    if n_tiles == 1 and B >= 128:
        n_tiles = 2                       # split a single fat tile for dual-TC
    elif n_tiles > 1 and n_tiles % 2:
        n_tiles += 1                      # keep the grid even for megacore
    tb = _round_up(-(-B // n_tiles), 8)
    return n_tiles, tb, n_tiles * tb


def _critic_mlp_kernel(obs_ref, act_ref, w1o_ref, w1a_ref, b1_ref,
                       w2_ref, b2_ref, w3_ref, b3_ref, o_ref):
    """One (head, batch-tile) grid step of the fused 3-layer critic MLP."""
    cdt = w1o_ref.dtype                              # MXU operand dtype (bf16 default)
    obs = obs_ref[...].astype(cdt)                   # (tb, n_obs)
    act = act_ref[...].astype(cdt)                   # (tb, n_act)

    # Layer 1: concat(obs, act) @ W1 == obs @ W1o + act @ W1a (fused concat).
    h1 = jnp.dot(obs, w1o_ref[0], preferred_element_type=jnp.float32)
    h1 = h1 + jnp.dot(act, w1a_ref[0], preferred_element_type=jnp.float32)
    h1 = jnp.maximum(h1 + b1_ref[0], 0.0)            # bias + ReLU in f32 (VPU)

    # Layer 2 (MXU, f32 accumulate).
    h2 = jnp.dot(h1.astype(cdt), w2_ref[0], preferred_element_type=jnp.float32)
    h2 = jnp.maximum(h2 + b2_ref[0], 0.0)            # (tb, H2) f32

    # Layer 3 (out dim 1): NT matmul (1, H2) x (tb, H2)^T -> (1, tb) so the
    # per-tile output row is lane-dense (unmasked stores, no (tb, 1) column).
    q = lax.dot_general(w3_ref[0].astype(cdt), h2.astype(cdt),
                        (((1,), (1,)), ((), ())),
                        preferred_element_type=jnp.float32)     # (1, tb)
    q = q + b3_ref[0]                                           # (1, tb) f32
    o_ref[...] = q.reshape(o_ref.shape).astype(o_ref.dtype)


def prepare_critic_params(raw_params, n_observation, *, compute_dtype=jnp.bfloat16):
    """One-time parameter prep (hoisted out of the per-step forward).

    `raw_params` is either a single (w1, b1, w2, b2, w3, b3) tuple or a
    sequence of such tuples (e.g. SAC twin critics).  Splits W1 into obs/act
    halves, casts matmul weights to the MXU compute dtype, reshapes biases /
    W3 into broadcast-friendly rows, and stacks heads on a leading axis."""
    if hasattr(raw_params[0], "ndim"):               # single head passed directly
        raw_params = [raw_params]
    w1o, w1a, b1s, w2s, b2s, w3s, b3s = ([] for _ in range(7))
    for (w1, b1, w2, b2, w3, b3) in raw_params:
        w1 = jnp.asarray(w1, jnp.float32)
        w1o.append(w1[:n_observation].astype(compute_dtype))    # (n_obs, H1)
        w1a.append(w1[n_observation:].astype(compute_dtype))    # (n_act, H1)
        b1s.append(jnp.asarray(b1, jnp.float32).reshape(1, -1)) # (1, H1)
        w2s.append(jnp.asarray(w2, jnp.float32).astype(compute_dtype))  # (H1, H2)
        b2s.append(jnp.asarray(b2, jnp.float32).reshape(1, -1)) # (1, H2)
        w3s.append(jnp.asarray(w3, jnp.float32).reshape(1, -1)) # (1, H2)
        b3s.append(jnp.asarray(b3, jnp.float32).reshape(1, 1))  # (1, 1)
    stack = lambda xs: jnp.stack(xs, axis=0)
    return (stack(w1o), stack(w1a), stack(b1s), stack(w2s),
            stack(b2s), stack(w3s), stack(b3s))


def _forward_impl(obs, act, params, tile_b):
    w1o, w1a, b1, w2, b2, w3, b3 = params
    n_heads, n_obs, H1 = w1o.shape
    n_act = w1a.shape[1]
    H2 = w2.shape[2]
    B = obs.shape[0]
    assert obs.shape[-1] == n_obs and act.shape[-1] == n_act, (obs.shape, act.shape)

    n_tiles, tb, B_pad = _batch_tiling(B, tile_b)
    if B_pad != B:
        obs = jnp.pad(obs, ((0, B_pad - B), (0, 0)))
        act = jnp.pad(act, ((0, B_pad - B), (0, 0)))

    whead = lambda h, i: (h, 0, 0)        # per-head, batch-invariant -> VMEM-resident
    in_specs = [
        pl.BlockSpec((tb, n_obs), lambda h, i: (i, 0)),      # obs tile
        pl.BlockSpec((tb, n_act), lambda h, i: (i, 0)),      # act tile
        pl.BlockSpec((1, n_obs, H1), whead),                 # W1_obs
        pl.BlockSpec((1, n_act, H1), whead),                 # W1_act
        pl.BlockSpec((1, 1, H1), whead),                     # b1
        pl.BlockSpec((1, H1, H2), whead),                    # W2
        pl.BlockSpec((1, 1, H2), whead),                     # b2
        pl.BlockSpec((1, 1, H2), whead),                     # W3 (row)
        pl.BlockSpec((1, 1, 1), whead),                      # b3
    ]
    out_specs = pl.BlockSpec((1, 1, 1, tb), lambda h, i: (h, i, 0, 0))

    itemsize = lambda a: jnp.dtype(a.dtype).itemsize
    param_bytes = sum(int(p.size) * itemsize(p) for p in params)
    cost = pl.CostEstimate(
        flops=int(2 * n_heads * B_pad * ((n_obs + n_act) * H1 + H1 * H2 + H2)),
        transcendentals=0,
        bytes_accessed=int(param_bytes + (obs.size + act.size + n_heads * B_pad) * 4),
    )

    out = pl.pallas_call(
        _critic_mlp_kernel,
        out_shape=jax.ShapeDtypeStruct((n_heads, n_tiles, 1, tb), jnp.float32),
        grid=(n_heads, n_tiles),
        in_specs=in_specs,
        out_specs=out_specs,
        compiler_params=pltpu.CompilerParams(
            dimension_semantics=("parallel", "parallel")),
        cost_estimate=cost,
    )(obs, act, w1o, w1a, b1, w2, b2, w3, b3)

    return out.reshape(n_heads, B_pad)[:, :B]            # (n_heads, B)


@functools.partial(jax.jit, static_argnames=("tile_b",))
def multi_critic_forward(obs, act, params, *, tile_b=1024):
    """Fused forward for a stack of critics (e.g. SAC twin Q1/Q2) -> (n_heads, B)."""
    return _forward_impl(obs, act, params, tile_b)


def critic_forward(obs, act, params, *, tile_b=1024):
    """CriticNN.forward: (obs, act) -> q of shape (B,) (single-head param stack)."""
    assert params[0].shape[0] == 1, "critic_forward expects a single-head param stack"
    return multi_critic_forward(obs, act, params, tile_b=tile_b)[0]


def init_critic_params(key, n_observation, n_action, layers=(256, 256)):
    """Deterministic init matching torch.nn.Linear default:
    U(-1/sqrt(fan_in), 1/sqrt(fan_in)) for both weight and bias (stored f32)."""
    dims = [n_observation + n_action, *layers, 1]
    params = []
    for i in range(len(dims) - 1):
        fan_in, fan_out = dims[i], dims[i + 1]
        bound = 1.0 / math.sqrt(fan_in)
        key, kw, kb = jax.random.split(key, 3)
        w = jax.random.uniform(kw, (fan_in, fan_out), jnp.float32, -bound, bound)
        b = jax.random.uniform(kb, (1, fan_out), jnp.float32, -bound, bound)
        params += [w, b]
    return tuple(params)


def critic_forward_ref(obs, act, raw_params, compute_dtype=jnp.bfloat16):
    """Pure-JAX reference mirroring the kernel's numerics (bf16 MXU operands
    for the hidden layers, f32 accumulation / elementwise, f32 final reduce)."""
    w1, b1, w2, b2, w3, b3 = raw_params
    x = jnp.concatenate([obs, act], axis=-1)
    h1 = jnp.maximum(
        jnp.dot(x.astype(compute_dtype), w1.astype(compute_dtype),
                preferred_element_type=jnp.float32) + b1.reshape(1, -1), 0.0)
    h2 = jnp.maximum(
        jnp.dot(h1.astype(compute_dtype), w2.astype(compute_dtype),
                preferred_element_type=jnp.float32) + b2.reshape(1, -1), 0.0)
    q = jnp.sum(h2 * w3.reshape(1, -1), axis=-1) + b3.reshape(-1)
    return q                                              # (B,)


if __name__ == "__main__":
    n_observation, n_action = 16, 8
    key = jax.random.PRNGKey(0)
    k_obs, k_act, k_p1, k_p2, k_obs2, k_act2 = jax.random.split(key, 6)

    # --- single CriticNN, tiny batch (module-spec shapes) ---------------------
    B = 8
    obs = jax.random.normal(k_obs, (B, n_observation), jnp.float32)
    act = jax.random.normal(k_act, (B, n_action), jnp.float32)
    raw1 = init_critic_params(k_p1, n_observation, n_action, layers=(256, 256))
    params1 = prepare_critic_params(raw1, n_observation)

    q = jax.block_until_ready(critic_forward(obs, act, params1))
    q_ref = critic_forward_ref(obs, act, raw1)
    assert q.shape == (B,), q.shape
    assert jnp.allclose(q, q_ref, atol=1e-2, rtol=1e-2), (q, q_ref)

    # --- fused SAC twin critics; batch exercising padding + multi-tile grid ---
    B2 = 300
    obs2 = jax.random.normal(k_obs2, (B2, n_observation), jnp.float32)
    act2 = jax.random.normal(k_act2, (B2, n_action), jnp.float32)
    raw2 = init_critic_params(k_p2, n_observation, n_action, layers=(256, 256))
    twin_params = prepare_critic_params([raw1, raw2], n_observation)

    q12 = jax.block_until_ready(
        multi_critic_forward(obs2, act2, twin_params, tile_b=64))
    assert q12.shape == (2, B2), q12.shape
    assert jnp.allclose(q12[0], critic_forward_ref(obs2, act2, raw1),
                        atol=2e-2, rtol=1e-2)
    assert jnp.allclose(q12[1], critic_forward_ref(obs2, act2, raw2),
                        atol=2e-2, rtol=1e-2)

    print("KERNEL_OK")
</pallas_src>

<mosaic_0001>
module attributes {stable_mosaic.version = 11 : i64} {
  func.func @_critic_mlp_kernel(%arg0: i32, %arg1: i32, %arg2: memref<8x16xf32, #tpu.memory_space<vmem>>, %arg3: memref<8x8xf32, #tpu.memory_space<vmem>>, %arg4: memref<1x16x256xbf16, #tpu.memory_space<vmem>>, %arg5: memref<1x8x256xbf16, #tpu.memory_space<vmem>>, %arg6: memref<1x1x256xf32, #tpu.memory_space<vmem>>, %arg7: memref<1x256x256xbf16, #tpu.memory_space<vmem>>, %arg8: memref<1x1x256xf32, #tpu.memory_space<vmem>>, %arg9: memref<1x1x256xf32, #tpu.memory_space<vmem>>, %arg10: memref<1x1x1xf32, #tpu.memory_space<vmem>>, %arg11: memref<1x1x1x8xf32, #tpu.memory_space<vmem>>) attributes {dimension_semantics = [#tpu.dimension_semantics<parallel>, #tpu.dimension_semantics<parallel>], iteration_bounds = array<i64: 1, 1>, scalar_prefetch = 0 : i64, scratch_operands = 0 : i64, tpu.core_type = #tpu.core_type<tc>, window_params = [{transform_indices = @transform_0, window_bounds = array<i64: 8, 16>}, {transform_indices = @transform_1, window_bounds = array<i64: 8, 8>}, {transform_indices = @transform_2, window_bounds = array<i64: 1, 16, 256>}, {transform_indices = @transform_3, window_bounds = array<i64: 1, 8, 256>}, {transform_indices = @transform_4, window_bounds = array<i64: 1, 1, 256>}, {transform_indices = @transform_5, window_bounds = array<i64: 1, 256, 256>}, {transform_indices = @transform_6, window_bounds = array<i64: 1, 1, 256>}, {transform_indices = @transform_7, window_bounds = array<i64: 1, 1, 256>}, {transform_indices = @transform_8, window_bounds = array<i64: 1, 1, 1>}, {transform_indices = @transform_9, window_bounds = array<i64: 1, 1, 1, 8>}]} {
    %c0 = arith.constant 0 : index
    %c0_0 = arith.constant 0 : index
    %0 = vector.load %arg2[%c0, %c0_0] : memref<8x16xf32, #tpu.memory_space<vmem>>, vector<8x16xf32>
    %1 = arith.truncf %0 : vector<8x16xf32> to vector<8x16xbf16>
    %c0_1 = arith.constant 0 : index
    %c0_2 = arith.constant 0 : index
    %2 = vector.load %arg3[%c0_1, %c0_2] : memref<8x8xf32, #tpu.memory_space<vmem>>, vector<8x8xf32>
    %3 = arith.truncf %2 : vector<8x8xf32> to vector<8x8xbf16>
    %c0_3 = arith.constant 0 : index
    %c0_4 = arith.constant 0 : index
    %c0_5 = arith.constant 0 : index
    %4 = vector.load %arg4[%c0_3, %c0_4, %c0_5] : memref<1x16x256xbf16, #tpu.memory_space<vmem>>, vector<1x16x256xbf16>
    %5 = vector.shape_cast %4 : vector<1x16x256xbf16> to vector<16x256xbf16>
    %cst = arith.constant dense<0.000000e+00> : vector<8x256xf32>
    %6 = tpu.matmul %1, %5, %cst {dimension_numbers = #tpu.dot_dimension_numbers<[1], [0], [0], [1], [0, 0, 1, 1], [], []>} : vector<8x16xbf16>, vector<16x256xbf16>, vector<8x256xf32> -> vector<8x256xf32>
    %c0_6 = arith.constant 0 : index
    %c0_7 = arith.constant 0 : index
    %c0_8 = arith.constant 0 : index
    %7 = vector.load %arg5[%c0_6, %c0_7, %c0_8] : memref<1x8x256xbf16, #tpu.memory_space<vmem>>, vector<1x8x256xbf16>
    %8 = vector.shape_cast %7 : vector<1x8x256xbf16> to vector<8x256xbf16>
    %cst_9 = arith.constant dense<0.000000e+00> : vector<8x256xf32>
    %9 = tpu.matmul %3, %8, %cst_9 {dimension_numbers = #tpu.dot_dimension_numbers<[1], [0], [0], [1], [0, 0, 1, 1], [], []>} : vector<8x8xbf16>, vector<8x256xbf16>, vector<8x256xf32> -> vector<8x256xf32>
    %10 = arith.addf %6, %9 : vector<8x256xf32>
    %c0_10 = arith.constant 0 : index
    %c0_11 = arith.constant 0 : index
    %c0_12 = arith.constant 0 : index
    %11 = vector.load %arg6[%c0_10, %c0_11, %c0_12] : memref<1x1x256xf32, #tpu.memory_space<vmem>>, vector<1x1x256xf32>
    %12 = vector.shape_cast %11 : vector<1x1x256xf32> to vector<1x256xf32>
    %13 = vector.broadcast %12 : vector<1x256xf32> to vector<8x256xf32>
    %14 = arith.addf %10, %13 : vector<8x256xf32>
    %cst_13 = arith.constant 0.000000e+00 : f32
    %15 = vector.broadcast %cst_13 : f32 to vector<8x256xf32>
    %16 = arith.maximumf %14, %15 : vector<8x256xf32>
    %17 = arith.truncf %16 : vector<8x256xf32> to vector<8x256xbf16>
    %c0_14 = arith.constant 0 : index
    %c0_15 = arith.constant 0 : index
    %c0_16 = arith.constant 0 : index
    %18 = vector.load %arg7[%c0_14, %c0_15, %c0_16] : memref<1x256x256xbf16, #tpu.memory_space<vmem>>, vector<1x256x256xbf16>
    %19 = vector.shape_cast %18 : vector<1x256x256xbf16> to vector<256x256xbf16>
    %cst_17 = arith.constant dense<0.000000e+00> : vector<8x256xf32>
    %20 = tpu.matmul %17, %19, %cst_17 {dimension_numbers = #tpu.dot_dimension_numbers<[1], [0], [0], [1], [0, 0, 1, 1], [], []>} : vector<8x256xbf16>, vector<256x256xbf16>, vector<8x256xf32> -> vector<8x256xf32>
    %c0_18 = arith.constant 0 : index
    %c0_19 = arith.constant 0 : index
    %c0_20 = arith.constant 0 : index
    %21 = vector.load %arg8[%c0_18, %c0_19, %c0_20] : memref<1x1x256xf32, #tpu.memory_space<vmem>>, vector<1x1x256xf32>
    %22 = vector.shape_cast %21 : vector<1x1x256xf32> to vector<1x256xf32>
    %23 = vector.broadcast %22 : vector<1x256xf32> to vector<8x256xf32>
    %24 = arith.addf %20, %23 : vector<8x256xf32>
    %cst_21 = arith.constant 0.000000e+00 : f32
    %25 = vector.broadcast %cst_21 : f32 to vector<8x256xf32>
    %26 = arith.maximumf %24, %25 : vector<8x256xf32>
    %c0_22 = arith.constant 0 : index
    %c0_23 = arith.constant 0 : index
    %c0_24 = arith.constant 0 : index
    %27 = vector.load %arg9[%c0_22, %c0_23, %c0_24] : memref<1x1x256xf32, #tpu.memory_space<vmem>>, vector<1x1x256xf32>
    %28 = vector.shape_cast %27 : vector<1x1x256xf32> to vector<1x256xf32>
    %29 = arith.truncf %28 : vector<1x256xf32> to vector<1x256xbf16>
    %30 = arith.truncf %26 : vector<8x256xf32> to vector<8x256xbf16>
    %cst_25 = arith.constant dense<0.000000e+00> : vector<1x8xf32>
    %31 = tpu.matmul %29, %30, %cst_25 {dimension_numbers = #tpu.dot_dimension_numbers<[1], [1], [0], [0], [0, 0, 1, 0], [], []>} : vector<1x256xbf16>, vector<8x256xbf16>, vector<1x8xf32> -> vector<1x8xf32>
    %c0_26 = arith.constant 0 : index
    %c0_27 = arith.constant 0 : index
    %c0_28 = arith.constant 0 : index
    %32 = vector.load %arg10[%c0_26, %c0_27, %c0_28] : memref<1x1x1xf32, #tpu.memory_space<vmem>>, vector<1x1x1xf32>
    %33 = vector.shape_cast %32 : vector<1x1x1xf32> to vector<1x1xf32>
    %34 = vector.broadcast %33 : vector<1x1xf32> to vector<1x8xf32>
    %35 = arith.addf %31, %34 : vector<1x8xf32>
    %36 = vector.shape_cast %35 : vector<1x8xf32> to vector<1x1x1x8xf32>
    %c0_29 = arith.constant 0 : index
    %c0_30 = arith.constant 0 : index
    %c0_31 = arith.constant 0 : index
    %c0_32 = arith.constant 0 : index
    %37 = vector.load %arg11[%c0_29, %c0_30, %c0_31, %c0_32] : memref<1x1x1x8xf32, #tpu.memory_space<vmem>>, vector<1x1x1x8xf32>
    tpu.vector_store %arg11[%c0_29, %c0_30, %c0_31, %c0_32], %36 {strides = array<i32>} : memref<1x1x1x8xf32, #tpu.memory_space<vmem>>, vector<1x1x1x8xf32>,
    return
  }
  func.func @transform_0(%arg0: i32, %arg1: i32) -> (i32, i32) {
    %c0_i32 = arith.constant 0 : i32
    %c0_i32_0 = arith.constant 0 : i32
    return %arg1, %c0_i32 : i32, i32
  }
  func.func @transform_1(%arg0: i32, %arg1: i32) -> (i32, i32) {
    %c0_i32 = arith.constant 0 : i32
    %c0_i32_0 = arith.constant 0 : i32
    return %arg1, %c0_i32 : i32, i32
  }
  func.func @transform_2(%arg0: i32, %arg1: i32) -> (i32, i32, i32) {
    %c0_i32 = arith.constant 0 : i32
    %c0_i32_0 = arith.constant 0 : i32
    %c0_i32_1 = arith.constant 0 : i32
    return %arg0, %c0_i32, %c0_i32_0 : i32, i32, i32
  }
  func.func @transform_3(%arg0: i32, %arg1: i32) -> (i32, i32, i32) {
    %c0_i32 = arith.constant 0 : i32
    %c0_i32_0 = arith.constant 0 : i32
    %c0_i32_1 = arith.constant 0 : i32
    return %arg0, %c0_i32, %c0_i32_0 : i32, i32, i32
  }
  func.func @transform_4(%arg0: i32, %arg1: i32) -> (i32, i32, i32) {
    %c0_i32 = arith.constant 0 : i32
    %c0_i32_0 = arith.constant 0 : i32
    %c0_i32_1 = arith.constant 0 : i32
    return %arg0, %c0_i32, %c0_i32_0 : i32, i32, i32
  }
  func.func @transform_5(%arg0: i32, %arg1: i32) -> (i32, i32, i32) {
    %c0_i32 = arith.constant 0 : i32
    %c0_i32_0 = arith.constant 0 : i32
    %c0_i32_1 = arith.constant 0 : i32
    return %arg0, %c0_i32, %c0_i32_0 : i32, i32, i32
  }
  func.func @transform_6(%arg0: i32, %arg1: i32) -> (i32, i32, i32) {
    %c0_i32 = arith.constant 0 : i32
    %c0_i32_0 = arith.constant 0 : i32
    %c0_i32_1 = arith.constant 0 : i32
    return %arg0, %c0_i32, %c0_i32_0 : i32, i32, i32
  }
  func.func @transform_7(%arg0: i32, %arg1: i32) -> (i32, i32, i32) {
    %c0_i32 = arith.constant 0 : i32
    %c0_i32_0 = arith.constant 0 : i32
    %c0_i32_1 = arith.constant 0 : i32
    return %arg0, %c0_i32, %c0_i32_0 : i32, i32, i32
  }
  func.func @transform_8(%arg0: i32, %arg1: i32) -> (i32, i32, i32) {
    %c0_i32 = arith.constant 0 : i32
    %c0_i32_0 = arith.constant 0 : i32
    %c0_i32_1 = arith.constant 0 : i32
    return %arg0, %c0_i32, %c0_i32_0 : i32, i32, i32
  }
  func.func @transform_9(%arg0: i32, %arg1: i32) -> (i32, i32, i32, i32) {
    %c0_i32 = arith.constant 0 : i32
    %c0_i32_0 = arith.constant 0 : i32
    %c0_i32_1 = arith.constant 0 : i32
    return %arg0, %arg1, %c0_i32, %c0_i32_0 : i32, i32, i32, i32
  }
}

</mosaic_0001>

<bundles_post_ra>
// kernel: multi_critic_forward.1
= control target key start
LH: loop header
LB: loop body
LE: loop exit
PB: predicated region body
PF: predicated region fallthrough
CT: control target
= control target key end

     0   :  { %s908_s0 = inlined_call_operand.hbm [shape: f32[8,16], index: 0, kind: input, shape index: {}]   ;;  %s909_s1 = inlined_call_operand.hbm [shape: f32[8,8], index: 1, kind: input, shape index: {}]   ;;  %s910_s2 = inlined_call_operand.hbm [shape: bf16[1,16,256], index: 2, kind: input, shape index: {}]   ;;  %s911_s3 = inlined_call_operand.vmem [shape: bf16[1,8,256], index: 3, kind: input, shape index: {}]   ;;  %s912_s4 = inlined_call_operand.vmem [shape: f32[1,1,256], index: 4, kind: input, shape index: {}]   ;;  %s913_s5 = inlined_call_operand.hbm [shape: bf16[1,256,256], index: 5, kind: input, shape index: {}]   ;;  %s914_s6 = inlined_call_operand.vmem [shape: f32[1,1,256], index: 6, kind: input, shape index: {}]   ;;  %s915_s7 = inlined_call_operand.vmem [shape: f32[1,1,256], index: 7, kind: input, shape index: {}]   ;;  %s916_s8 = inlined_call_operand.<no memory space> [shape: f32[1,1,1], index: 8, kind: input, shape index: {}]   ;;  %s917_s9 = inlined_call_operand.hbm [shape: f32[1,1,1,8], index: 9, kind: output, shape index: {}]  }
   0x1   :  { %v14_v0 = vstv %s916_s8 }
   0x2   :  { %15 = vst [vmem:[#allocation2] sm:$0x1] %v14_v0 }
   0x3   :  { %16 = vsyncpa [#allocation4], 0 }
   0x4   :  { %17 = vsyncpa [#allocation7], 0 }
   0x5   :  { %18 = vsyncpa [#allocation10], 0 }
   0x6   :  { %19 = vsyncpa [#allocation5], 0  ;;  %s775_s11 = smov [#allocation6]   ;;  %s776_s13 = smov [#allocation3]  }
   0x7   :  { %s36_s12 = sshll.u32 %s775_s11, 4  ;;  %s26_s14 = sshll.u32 %s776_s13, 4  ;;  %s37_s12 = int_to_ptr.vmem [resolvable:$true] %s36_s12  ;;  %s27_s14 = int_to_ptr.vmem [resolvable:$true] %s26_s14 }
   0x8   :  { %s657_s17 = scalar_lea.hbm %s909_s1, 128 }
   0x9   :  { %p658_p0 = scmp.ne.s32.totalorder %s909_s1, %s657_s17  ;;  %p661_p1 = scmp.lt.u32.totalorder %s657_s17, %s909_s1 }
   0xb   :  { %p663_p2 = pnand %p661_p1, %p658_p0 }
   0xd   :  { %666 = shalt.err (!%p663_p2)
}
   0xe   :  { %s667_s21 = scalar_lea.vmem %s37_s12, 128  ;;  %p672_p4 = scmp.lt.s32.totalorder %s37_s12, %s37_s12 }
   0xf   :  { %p668_p3 = scmp.ne.s32.totalorder %s37_s12, %s667_s21  ;;  %p673_p5 = scmp.lt.s32.totalorder %s667_s21, %s667_s21 }
  0x11   :  { %p674_p6 = por %p673_p5, %p672_p4 }
  0x13   :  { %p675_p7 = pnand %p674_p6, %p668_p3 }
  0x15   :  { %678 = shalt.err (!%p675_p7)
}
  0x16   :  { %39 = dma.hbm_to_vmem [thread:$0]  %s909_s1, 128, %s37_s12, [#allocation7]  }
  0x17   :  { %s679_s26 = scalar_lea.hbm %s908_s0, 128 }
  0x18   :  { %p680_p8 = scmp.ne.s32.totalorder %s908_s0, %s679_s26  ;;  %p683_p9 = scmp.lt.u32.totalorder %s679_s26, %s908_s0 }
  0x1a   :  { %p685_p10 = pnand %p683_p9, %p680_p8 }
  0x1c   :  { %688 = shalt.err (!%p685_p10)
}
  0x1d   :  { %s689_s10 = scalar_lea.vmem %s27_s14, 128  ;;  %p694_p12 = scmp.lt.s32.totalorder %s27_s14, %s27_s14 }
  0x1e   :  { %p690_p11 = scmp.ne.s32.totalorder %s27_s14, %s689_s10  ;;  %p695_p13 = scmp.lt.s32.totalorder %s689_s10, %s689_s10 }
  0x20   :  { %p696_p0 = por %p695_p13, %p694_p12 }
  0x22   :  { %p697_p1 = pnand %p696_p0, %p690_p11 }
  0x24   :  { %700 = shalt.err (!%p697_p1)
}
  0x25   :  { %29 = dma.hbm_to_vmem [thread:$0]  %s908_s0, 128, %s27_s14, [#allocation4]  }
  0x26   :  { %s777_s12 = smov [#allocation8]   ;;  %s701_s17 = scalar_lea.hbm %s910_s2, 256 }
  0x27   :  { %s45_s13 = sshll.u32 %s777_s12, 4  ;;  %p702_p2 = scmp.ne.s32.totalorder %s910_s2, %s701_s17  ;;  %s46_s13 = int_to_ptr.vmem [resolvable:$true] %s45_s13 }
  0x28   :  { %p705_p3 = scmp.lt.u32.totalorder %s701_s17, %s910_s2 }
  0x2a   :  { %p707_p4 = pnand %p705_p3, %p702_p2 }
  0x2c   :  { %710 = shalt.err (!%p707_p4)
}
  0x2d   :  { %s711_s21 = scalar_lea.vmem %s46_s13, 256  ;;  %p716_p6 = scmp.lt.s32.totalorder %s46_s13, %s46_s13 }
  0x2e   :  { %p712_p5 = scmp.ne.s32.totalorder %s46_s13, %s711_s21  ;;  %p717_p7 = scmp.lt.s32.totalorder %s711_s21, %s711_s21 }
  0x30   :  { %p718_p8 = por %p717_p7, %p716_p6 }
  0x32   :  { %p719_p9 = pnand %p718_p8, %p712_p5 }
  0x34   :  { %722 = shalt.err (!%p719_p9)
}
  0x35   :  { %s778_s0 = smov 128   ;;  %s779_s14 = smov 8  }
  0x36   :  { %51 = dma.hbm_to_vmem [thread:$0]  %s910_s2, 256, %s46_s13, [#allocation7], %s778_s0, %s778_s0, %s779_s14  }
  0x37   :  { %s780_s24 = smov [#allocation9]   ;;  %s723_s28 = scalar_lea.hbm %s913_s5, 4096 }
  0x38   :  { %s61_s25 = sshll.u32 %s780_s24, 4  ;;  %p724_p10 = scmp.ne.s32.totalorder %s913_s5, %s723_s28  ;;  %s62_s25 = int_to_ptr.vmem [resolvable:$true] %s61_s25 }
  0x39   :  { %p727_p11 = scmp.lt.u32.totalorder %s723_s28, %s913_s5 }
  0x3b   :  { %p729_p12 = pnand %p727_p11, %p724_p10 }
  0x3d   :  { %732 = shalt.err (!%p729_p12)
}
  0x3e   :  { %s733_s11 = scalar_lea.vmem %s62_s25, 4096  ;;  %p738_p0 = scmp.lt.s32.totalorder %s62_s25, %s62_s25 }
  0x3f   :  { %p734_p13 = scmp.ne.s32.totalorder %s62_s25, %s733_s11  ;;  %p739_p1 = scmp.lt.s32.totalorder %s733_s11, %s733_s11 }
  0x41   :  { %p740_p2 = por %p739_p1, %p738_p0 }
  0x43   :  { %p741_p3 = pnand %p740_p2, %p734_p13 }
  0x45   :  { %744 = shalt.err (!%p741_p3)
}
  0x46   :  { %67 = dma.hbm_to_vmem [thread:$0]  %s913_s5, 4096, %s62_s25, [#allocation10], %s778_s0, %s778_s0, %s779_s14  }
  0x47   :  { %767 = dma.done.wait [#allocation4], 128  }
  0x48   :  { %768 = vsyncadd [#allocation4], 4294967168 }
  0x49   :  { %769 = dma.done.wait [#allocation7], 384  }
  0x4a   :  { %770 = vsyncadd [#allocation7], 4294966912 }
  0x4b   :  { %771 = dma.done.wait [#allocation10], 4096  }
  0x4c   :  { %772 = vsyncadd [#allocation10], 4294963200  ;;  %v781_v1 = vmov 0   ;;  %v93_v2 = vld [vmem:[%s911_s3] sm:$0xff]  ;;  %vm103_vm0 = vcmask 1043456   ;;  %v89_v3 = vld [vmem:[#allocation6] sm:$0xff]  ;;  %v208_v44 = vlaneseq }
  0x4d   :  { %142 = vmatprep.mubr.bf16.mxu1 %v781_v1  ;;  %603 = vset.pattern.permute.xlu0 %v781_v1  ;;  %v557_v4 = vcombine.high %v93_v2, %v93_v2  ;;  %v556_v5 = vcombine.low %v93_v2, %v93_v2  ;;  %v608_v6 = vld [vmem:[#allocation8 + $0x4] ss:$8 sps:$4 sm:$0xff]   ;;  %v90_v8 = vpack.c.bf16 %v89_v3, %v89_v3  ;;  %v609_v9 = vld [vmem:[#allocation9 + $0x4] ss:$8 sps:$4 sm:$0xff]   ;;  %v611_v10 = vld [vmem:[#allocation9] ss:$8 sps:$4 sm:$0xff]  }
  0x4e   :  { %vm99_vm1 = vcmask 64512   ;;  %v606_v11 = vld [vmem:[#allocation8] ss:$8 sps:$4 sm:$0xff]   ;;  %v612_v12 = vld [vmem:[#allocation9 + $0x14] ss:$8 sps:$4 sm:$0xff]   ;;  %428 = vmatprep.subr.bf16.mxu0 %v609_v9  ;;  %v87_v15 = vld [vmem:[#allocation3] sm:$0xff] }
  0x4f   :  { %558 = vmatprep.subr.msk.bf16.mxu1 %vm103_vm0, %v557_v4  ;;  %v105_v7 = vsel %vm103_vm0, %v556_v5, 0  ;;  %429 = vmatpush1.bf16.msra.mxu0 %v611_v10  ;;  %v614_v13 = vld [vmem:[#allocation9 + $0x10] ss:$8 sps:$4 sm:$0xff]   ;;  %v615_v14 = vld [vmem:[#allocation9 + $0x24] ss:$8 sps:$4 sm:$0xff]   ;;  %v88_v17 = vpack.c.bf16 %v87_v15, %v87_v15  ;;  %vm161_vm2 = vcmask 130048  }
  0x50   :  { %111 = vmatpush1.bf16.msra.mxu1 %v105_v7  ;;  %430 = vmatprep.subr.bf16.mxu0 %v612_v12  ;;  %v617_v16 = vld [vmem:[#allocation9 + $0x20] ss:$8 sps:$4 sm:$0xff]   ;;  %v618_v18 = vld [vmem:[#allocation9 + $0x34] ss:$8 sps:$4 sm:$0xff]   ;;  %v620_v19 = vld [vmem:[#allocation9 + $0x30] ss:$8 sps:$4 sm:$0xff]  }
  0x51   :  { %165 = vmatprep.subr.bf16.mxu1 %v608_v6  ;;  %v621_v20 = vld [vmem:[#allocation9 + $0x44] ss:$8 sps:$4 sm:$0xff]   ;;  %v623_v21 = vld [vmem:[#allocation9 + $0x40] ss:$8 sps:$4 sm:$0xff]   ;;  %v624_v22 = vld [vmem:[#allocation9 + $0x54] ss:$8 sps:$4 sm:$0xff]  }
  0x52   :  { %v626_v23 = vld [vmem:[#allocation9 + $0x50] ss:$8 sps:$4 sm:$0xff]   ;;  %v627_v24 = vld [vmem:[#allocation9 + $0x64] ss:$8 sps:$4 sm:$0xff]   ;;  %v629_v25 = vld [vmem:[#allocation9 + $0x60] ss:$8 sps:$4 sm:$0xff]  }
  0x53   :  { %559 = vmatmul.mubr.msk.bf16.vlgmr.msra.gmra.mrb[0].mxu1 %vm99_vm1, %v90_v8  ;;  %431 = vmatpush1.bf16.msra.mxu0 %v614_v13  ;;  %v630_v26 = vld [vmem:[#allocation9 + $0x74] ss:$8 sps:$4 sm:$0xff]   ;;  %v632_v27 = vld [vmem:[#allocation9 + $0x70] ss:$8 sps:$4 sm:$0xff]   ;;  %v633_v28 = vld [vmem:[#allocation9 + $0x84] ss:$8 sps:$4 sm:$0xff]  }
  0x54   :  { %166 = vmatpush1.bf16.msra.mxu1 %v606_v11  ;;  %197 = vmatprep.mubr.bf16.mxu1 %v781_v1  ;;  %v635_v29 = vld [vmem:[#allocation9 + $0x80] ss:$8 sps:$4 sm:$0xff]   ;;  %v636_v30 = vld [vmem:[#allocation9 + $0x94] ss:$8 sps:$4 sm:$0xff]   ;;  %v638_v31 = vld [vmem:[#allocation9 + $0x90] ss:$8 sps:$4 sm:$0xff]  }
  0x55   :  { %432 = vmatprep.subr.bf16.mxu0 %v615_v14  ;;  %v639_v32 = vld [vmem:[#allocation9 + $0xa4] ss:$8 sps:$4 sm:$0xff]   ;;  %v641_v33 = vld [vmem:[#allocation9 + $0xa0] ss:$8 sps:$4 sm:$0xff]   ;;  %v642_v34 = vld [vmem:[#allocation9 + $0xb4] ss:$8 sps:$4 sm:$0xff]  }
  0x56   :  { %v644_v35 = vld [vmem:[#allocation9 + $0xb0] ss:$8 sps:$4 sm:$0xff]   ;;  %v645_v36 = vld [vmem:[#allocation9 + $0xc4] ss:$8 sps:$4 sm:$0xff]   ;;  %v647_v37 = vld [vmem:[#allocation9 + $0xc0] ss:$8 sps:$4 sm:$0xff]  }
  0x57   :  { %433 = vmatpush1.bf16.msra.mxu0 %v617_v16  ;;  %v648_v38 = vld [vmem:[#allocation9 + $0xd4] ss:$8 sps:$4 sm:$0xff]   ;;  %v650_v39 = vld [vmem:[#allocation9 + $0xd0] ss:$8 sps:$4 sm:$0xff]   ;;  %v651_v40 = vld [vmem:[#allocation9 + $0xe4] ss:$8 sps:$4 sm:$0xff]  }
  0x58   :  { %434 = vmatprep.subr.bf16.mxu0 %v618_v18  ;;  %v653_v41 = vld [vmem:[#allocation9 + $0xe0] ss:$8 sps:$4 sm:$0xff]   ;;  %v654_v42 = vld [vmem:[#allocation9 + $0xf4] ss:$8 sps:$4 sm:$0xff]   ;;  %v656_v43 = vld [vmem:[#allocation9 + $0xf0] ss:$8 sps:$4 sm:$0xff]  }
  0x59   :  { %v209_v45 = vshrl.u32 %v208_v44, 7  ;;  %v206_v51 = vld [vmem:[%s912_s4] sm:$0x3]  ;;  %vm537_vm3 = vcmask 57344  }
  0x5a   :  { %v471_v3 = vld [vmem:[%s915_s7] sm:$0x3] }
  0x5b   :  { %562 = vmatmul.mubr.msk.bf16.vlgmr.msra.gmra.mrb[4].mxu1 %vm161_vm2, %v88_v17  ;;  %435 = vmatpush1.bf16.msra.mxu0 %v620_v19  ;;  %v210_v50 = vsub.s32 0, %v209_v45  ;;  %v214_v52 = vsub.s32 1, %v209_v45  ;;  %v487_v6 = vld [vmem:[#allocation2] sm:$0x1] }
  0x5c   :  { %436 = vmatprep.subr.bf16.mxu0 %v621_v20  ;;  %490 = vperm.xlu0 %603, %v487_v6   ;;  %v256_v7 = vld [vmem:[%s914_s6] sm:$0x3]  ;;  %s782_s6 = smov [#allocation11]  }
  0x5d   :  { %v211_v53 = vrot.slane %v206_v51, %v210_v50  ;;  %v215_v55 = vrot.slane %v206_v51, %v214_v52  ;;  %v480_v4 = vrot.slane %v471_v3, %v214_v52  ;;  %v261_v8 = vrot.slane %v256_v7, %v210_v50  ;;  %s545_s7 = sshll.u32 %s782_s6, 4  ;;  %s546_s7 = int_to_ptr.vmem [resolvable:$true] %s545_s7 }
  0x5e   :  { %v265_v9 = vrot.slane %v256_v7, %v214_v52  ;;  %v476_v20 = vrot.slane %v471_v3, %v210_v50  ;;  %s745_s19 = scalar_lea.vmem %s546_s7, 16  ;;  %s749_s8 = scalar_lea.vmem %s546_s7, 32 }
  0x5f   :  { %437 = vmatpush1.bf16.msra.mxu0 %v623_v21  ;;  %v484_v5 = vpack.c.bf16 %v480_v4, %v480_v4  ;;  %p746_p4 = scmp.ne.s32.totalorder %s546_s7, %s745_s19  ;;  %p750_p5 = scmp.lt.s32.totalorder %s546_s7, %s546_s7 }
  0x60   :  { %438 = vmatprep.subr.bf16.mxu0 %v624_v22  ;;  %v483_v21 = vpack.c.bf16 %v476_v20, %v476_v20  ;;  %p751_p6 = scmp.lt.s32.totalorder %s749_s8, %s745_s19 }
  0x61   :  { %529 = vmatprep.mubr.bf16.mxu1 %v484_v5 }
  0x62   :  { %p752_p7 = por %p751_p6, %p750_p5 }
  0x63   :  { %439 = vmatpush1.bf16.msra.mxu0 %v626_v23 }
  0x64   :  { %440 = vmatprep.subr.bf16.mxu0 %v627_v24  ;;  %p753_p8 = pnand %p752_p7, %p746_p4 }
  0x67   :  { %441 = vmatpush1.bf16.msra.mxu0 %v629_v25 }
  0x68   :  { %442 = vmatprep.subr.bf16.mxu0 %v630_v26 }
  0x6b   :  { %443 = vmatpush1.bf16.msra.mxu0 %v632_v27 }
  0x6c   :  { %444 = vmatprep.subr.bf16.mxu0 %v633_v28 }
  0x6f   :  { %445 = vmatpush1.bf16.msra.mxu0 %v635_v29 }
  0x70   :  { %446 = vmatprep.subr.bf16.mxu0 %v636_v30 }
  0x73   :  { %447 = vmatpush1.bf16.msra.mxu0 %v638_v31 }
  0x74   :  { %448 = vmatprep.subr.bf16.mxu0 %v639_v32 }
  0x77   :  { %449 = vmatpush1.bf16.msra.mxu0 %v641_v33 }
  0x78   :  { %450 = vmatprep.subr.bf16.mxu0 %v642_v34 }
  0x7b   :  { %451 = vmatpush1.bf16.msra.mxu0 %v644_v35 }
  0x7c   :  { %452 = vmatprep.subr.bf16.mxu0 %v645_v36 }
  0x7f   :  { %453 = vmatpush1.bf16.msra.mxu0 %v647_v37 }
  0x80   :  { %454 = vmatprep.subr.bf16.mxu0 %v648_v38 }
  0x83   :  { %455 = vmatpush1.bf16.msra.mxu0 %v650_v39 }
  0x84   :  { %456 = vmatprep.subr.bf16.mxu0 %v651_v40 }
  0x87   :  { %457 = vmatpush1.bf16.msra.mxu0 %v653_v41 }
  0x88   :  { %458 = vmatprep.subr.bf16.mxu0 %v654_v42 }
  0x8b   :  { %459 = vmatpush1.bf16.msra.mxu0 %v656_v43 }
  0xdb   :  { %v491_v22 = vpop.permute.xlu0 %490 }
  0xdc   :  { %v496_v23 = vrot.slane %v491_v22, %v210_v50 }
 0x126   :  { %v144_v46 = vpop.f32.mrb[0].mxu1 }
 0x127   :  { %v146_v47 = vpop.f32.mrb[1].mxu1 }
 0x128   :  { %v148_v48 = vpop.f32.mrb[2].mxu1 }
 0x129   :  { %v149_v49 = vpop.f32.mrb[3].mxu1 }
 0x12e   :  { %v199_v54 = vpop.f32.mrb[4].mxu1 }
 0x12f   :  { %v200_v56 = vadd.f32 %v199_v54, %v144_v46  ;;  %v201_v57 = vpop.f32.mrb[5].mxu1 }
 0x130   :  { %v202_v58 = vadd.f32 %v201_v57, %v146_v47  ;;  %v203_v59 = vpop.f32.mrb[6].mxu1 }
 0x131   :  { %v218_v60 = vadd.f32 %v211_v53, %v200_v56  ;;  %v204_v61 = vpop.f32.mrb[7].mxu1 }
 0x132   :  { %v219_v62 = vadd.f32 %v215_v55, %v202_v58 }
 0x133   :  { %v220_v63 = vmax.f32 %v218_v60, 0.0 }
 0x134   :  { %v221_v0 = vmax.f32 %v219_v62, 0.0 }
 0x135   :  { %v222_v2 = vpack.c.bf16 %v220_v63, %v220_v63 }
 0x136   :  { %v223_v1 = vpack.c.bf16 %v221_v0, %v221_v0 }
 0x138   :  { %460 = vmatprep.mubr.bf16.mxu0 %v223_v1 }
 0x139   :  { %461 = vmatmul.mubr.bf16.vlgmr.msra.gmra.mrb[0].mxu0 %v222_v2 }
 0x20c   :  { %v462_v10 = vpop.f32.mrb[0].mxu0 }
 0x20d   :  { %v463_v11 = vadd.f32 %v462_v10, %v261_v8  ;;  %v464_v12 = vpop.f32.mrb[1].mxu0 }
 0x20e   :  { %v465_v13 = vadd.f32 %v464_v12, %v265_v9  ;;  %v466_v14 = vpop.f32.mrb[2].mxu0 }
 0x20f   :  { %v469_v15 = vmax.f32 %v463_v11, 0.0  ;;  %v467_v16 = vpop.f32.mrb[3].mxu0 }
 0x210   :  { %v470_v17 = vmax.f32 %v465_v13, 0.0 }
 0x211   :  { %v485_v19 = vpack.c.bf16 %v469_v15, %v469_v15 }
 0x212   :  { %v486_v18 = vpack.c.bf16 %v470_v17, %v470_v17 }
 0x214   :  { %497 = vmatprep.subr.bf16.mxu1 %v486_v18 }
 0x215   :  { %498 = vmatpush1.bf16.xpose.msra.mxu1 %v485_v19 }
 0x21c   :  { %530 = vmatmul.mubr.bf16.vlgmr.msra.gmra.mrb[8].mxu1 %v483_v21 }
 0x2ef   :  { %v531_v24 = vpop.f32.mrb[8].mxu1 }
 0x2f0   :  { %v532_v25 = vadd.f32 %v531_v24, %v496_v23  ;;  %v533_v26 = vpop.f32.mrb[9].mxu1 }
 0x2f1   :  { %v534_v27 = vpop.f32.mrb[10].mxu1 }
 0x2f2   :  { %v535_v28 = vpop.f32.mrb[11].mxu1  ;;  %538 = vst.msk [vmem:[#allocation11] sm:$0x1] %vm537_vm3, %v532_v25 }
 0x2f3   :  { %756 = shalt.err (!%p753_p8)
}
 0x2f4   :  { %s757_s0 = scalar_lea.hbm %s917_s9, 16 }
 0x2f5   :  { %p758_p9 = scmp.ne.s32.totalorder %s917_s9, %s757_s0  ;;  %p761_p10 = scmp.lt.u32.totalorder %s757_s0, %s917_s9 }
 0x2f7   :  { %p763_p11 = pnand %p761_p10, %p758_p9 }
 0x2f9   :  { %766 = shalt.err (!%p763_p11)
}
 0x2fa   :  { %548 = dma.vmem_to_hbm [thread:$0]  %s546_s7, 16, %s917_s9, [#allocation5]  }
 0x2fb   :  { %773 = dma.done.wait [#allocation5], 16  }
 0x2fc   :  { %774 = vsyncadd [#allocation5], 4294967280 }
 0x2fd   :  { %552 = vsyncpa [#allocation4], 1 }
 0x2fe   :  { %553 = vsyncpa [#allocation7], 1 }
 0x2ff   :  { %554 = vsyncpa [#allocation10], 1 }
 0x300   :  { %555 = vsyncpa [#allocation5], 1 }

</bundles_post_ra>
